<compile_context>
chip_gen: v7x
topology: tpu7x:2x2x1
jax: 0.10.0
libtpu: 0.0.40
codegen_flags: <defaults>
</compile_context>

<pallas_src>
import functools

import jax
import jax.numpy as jnp
from jax.experimental import pallas as pl
from jax.experimental.pallas import tpu as pltpu

CA = 420.0  # ambient CO2 concentration (constant in the module)


def _round_up(x, m):
    return ((x + m - 1) // m) * m


def _round_down(x, m):
    return (x // m) * m


def _bwb_kernel(gs0_ref, a1s_ref, fgs_ref, a_ref, rh_ref, o_ref, *, num_fgs):
    """gs = gs0[FGs] + (a1/Ca)[FGs] * A * rh over one (tile_m, tile_n) tile.

    gs0_ref / a1s_ref: (num_fgs,) f32 in SMEM (a1s already divided by Ca).
    fgs_ref:           (tile_m, tile_n) int32 in VMEM.
    a_ref, rh_ref:     (tile_m, tile_n) f32 in VMEM.
    """
    # Select per-group parameters once (1 cmp + 2 selects per group), then a
    # single FMA.  Group 0 is the default branch (also catches OOB indices and
    # the masked ragged-block region).
    gs0_sel = gs0_ref[0]
    a1_sel = a1s_ref[0]
    if num_fgs > 1:
        fgs = fgs_ref[...]
        for f in range(1, num_fgs):          # static, small select chain
            m = fgs == f
            gs0_sel = jnp.where(m, gs0_ref[f], gs0_sel)
            a1_sel = jnp.where(m, a1s_ref[f], a1_sel)
    o_ref[...] = gs0_sel + a1_sel * (a_ref[...] * rh_ref[...])


def _vmem_capacity_bytes():
    """Per-TensorCore VMEM capacity; conservative fallback if query fails."""
    try:
        info = pltpu.get_tpu_info()
        for attr in ("vmem_capacity_bytes", "vmem_size_bytes", "vmem_bytes"):
            v = getattr(info, attr, None)
            if v:
                return int(v)
    except Exception:
        pass
    return 64 << 20  # v7x per-TC size; safe lower bound for all generations


def bwb_forward(gs0, a1, fgs, A, rh):
    """Pallas wrapper.

    gs0, a1: (num_FGs,) f32 parameters
    fgs:     (M, N) integer functional-group index per element
    A, rh:   (M, N) f32
    returns  (M, N) f32 stomatal conductance gs
    """
    M, N = A.shape
    num_fgs = int(gs0.shape[0])

    # Dtype hygiene only when needed -- no unconditional per-call HBM passes.
    if gs0.dtype != jnp.float32:
        gs0 = gs0.astype(jnp.float32)
    a1_scaled = a1.astype(jnp.float32) / jnp.float32(CA)   # tiny (num_fgs,)
    if fgs.dtype != jnp.int32:
        fgs = fgs.astype(jnp.int32)
    if A.dtype != jnp.float32:
        A = A.astype(jnp.float32)
    if rh.dtype != jnp.float32:
        rh = rh.astype(jnp.float32)

    # Generation-aware byte budget for the double-buffered working set:
    # ~24 MiB on v7x (64 MiB VMEM/TC), capped at 48 MiB on v5e/v6e (128 MiB).
    vmem_cap = _vmem_capacity_bytes()
    budget = int(min(max(vmem_cap // 2 - (8 << 20), 16 << 20), 48 << 20))

    # Double-buffered bytes per element: fgs(int32) + A + rh + out, all 4 B.
    bpe2 = 2 * (4 + 4 + 4 + 4)

    # Lane tile: keep the full (lane-dense) width unless even an 8-row slab
    # would overflow the budget; then split N on a second parallel grid axis.
    tile_n = N
    if 8 * N * bpe2 > budget:
        tile_n = min(N, max(128, _round_down(budget // (8 * bpe2), 128)))

    # Row tile: fill the budget; force >= 2 row tiles when M allows so both
    # v7x TensorCores get work (negligible cost on single-TC chips).
    tile_m = max(8, _round_down(budget // (tile_n * bpe2), 8))
    if M > 8:
        tile_m = min(tile_m, _round_up(pl.cdiv(M, 2), 8))
    tile_m = min(tile_m, _round_up(M, 8))

    grid = (pl.cdiv(M, tile_m), pl.cdiv(N, tile_n))

    elem_spec = pl.BlockSpec((tile_m, tile_n), lambda i, j: (i, j))
    smem_spec = pl.BlockSpec(memory_space=pltpu.MemorySpace.SMEM)

    working_set = tile_m * tile_n * bpe2
    vmem_limit = int(min(max(working_set + (4 << 20), 16 << 20),
                         budget + (4 << 20)))

    cost = pl.CostEstimate(
        flops=(2 + 3 * max(num_fgs - 1, 0)) * M * N,
        transcendentals=0,
        bytes_accessed=16 * M * N + 8 * num_fgs,
    )

    kernel = functools.partial(_bwb_kernel, num_fgs=num_fgs)

    return pl.pallas_call(
        kernel,
        out_shape=jax.ShapeDtypeStruct((M, N), jnp.float32),
        grid_spec=pltpu.PrefetchScalarGridSpec(
            num_scalar_prefetch=0,
            grid=grid,
            in_specs=[smem_spec, smem_spec, elem_spec, elem_spec, elem_spec],
            out_specs=pl.BlockSpec((tile_m, tile_n), lambda i, j: (i, j)),
        ),
        compiler_params=pltpu.CompilerParams(
            dimension_semantics=("parallel", "parallel"),
            vmem_limit_bytes=vmem_limit,
        ),
        cost_estimate=cost,
    )(gs0, a1_scaled, fgs, A, rh)


def bwb_reference(gs0, a1, fgs, A, rh):
    """Plain-JAX reference mirroring the PyTorch forward."""
    return gs0[fgs] + a1[fgs] * A * rh / CA


def _run_case(key, M, N, num_fgs):
    k_fgs, k_a, k_rh = jax.random.split(key, 3)
    fgs = jax.random.randint(k_fgs, (M, N), 0, num_fgs, dtype=jnp.int32)
    A = jax.random.uniform(k_a, (M, N), jnp.float32, 0.0, 30.0)   # umol m-2 s-1
    rh = jax.random.uniform(k_rh, (M, N), jnp.float32, 0.2, 1.0)  # fraction

    # Module init is torch.ones(num_FGs); use distinct values so the per-group
    # gather is actually exercised.
    gs0 = 1.0 + 0.1 * jnp.arange(num_fgs, dtype=jnp.float32)
    a1 = 1.0 + 0.05 * jnp.arange(num_fgs, dtype=jnp.float32)

    gs = jax.block_until_ready(bwb_forward(gs0, a1, fgs, A, rh))

    ref = bwb_reference(gs0, a1, fgs, A, rh)
    assert gs.shape == (M, N) and gs.dtype == jnp.float32
    assert jnp.allclose(gs, ref, rtol=1e-5, atol=1e-6), "mismatch vs reference"


if __name__ == "__main__":
    key = jax.random.PRNGKey(0)
    k1, k2, k3 = jax.random.split(key, 3)

    # Small shapes consistent with the module: "sites" x "pixels".
    _run_case(k1, M=8, N=128, num_fgs=4)     # tiny, single tile
    _run_case(k2, M=200, N=256, num_fgs=4)   # non-multiple-of-8 M -> ragged last block, grid_m=2
    _run_case(k3, M=40, N=128, num_fgs=1)    # lcpd=None default path (single FG)

    print("KERNEL_OK")
</pallas_src>

<mosaic_0001>
module attributes {stable_mosaic.version = 11 : i64} {
  func.func @_bwb_kernel(%arg0: i32, %arg1: i32, %arg2: memref<4xf32, #tpu.memory_space<smem>>, %arg3: memref<4xf32, #tpu.memory_space<smem>>, %arg4: memref<8x128xi32, #tpu.memory_space<vmem>>, %arg5: memref<8x128xf32, #tpu.memory_space<vmem>>, %arg6: memref<8x128xf32, #tpu.memory_space<vmem>>, %arg7: memref<8x128xf32, #tpu.memory_space<vmem>>) attributes {dimension_semantics = [#tpu.dimension_semantics<parallel>, #tpu.dimension_semantics<parallel>], iteration_bounds = array<i64: 1, 1>, scalar_prefetch = 0 : i64, scratch_operands = 0 : i64, tpu.core_type = #tpu.core_type<tc>, window_params = [{transform_indices = @transform_0, window_bounds = array<i64: 4>}, {transform_indices = @transform_1, window_bounds = array<i64: 4>}, {transform_indices = @transform_2, window_bounds = array<i64: 8, 128>}, {transform_indices = @transform_3, window_bounds = array<i64: 8, 128>}, {transform_indices = @transform_4, window_bounds = array<i64: 8, 128>}, {transform_indices = @transform_5, window_bounds = array<i64: 8, 128>}]} {
    %c0 = arith.constant 0 : index
    %0 = memref.load %arg2[%c0] : memref<4xf32, #tpu.memory_space<smem>>
    %c0_0 = arith.constant 0 : index
    %1 = memref.load %arg3[%c0_0] : memref<4xf32, #tpu.memory_space<smem>>
    %c0_1 = arith.constant 0 : index
    %c0_2 = arith.constant 0 : index
    %2 = vector.load %arg4[%c0_1, %c0_2] : memref<8x128xi32, #tpu.memory_space<vmem>>, vector<8x128xi32>
    %c1_i32 = arith.constant 1 : i32
    %3 = vector.broadcast %c1_i32 : i32 to vector<8x128xi32>
    %4 = arith.cmpi eq, %2, %3 : vector<8x128xi32>
    %c1 = arith.constant 1 : index
    %5 = memref.load %arg2[%c1] : memref<4xf32, #tpu.memory_space<smem>>
    %6 = vector.broadcast %5 : f32 to vector<8x128xf32>
    %7 = vector.broadcast %0 : f32 to vector<8x128xf32>
    %8 = arith.select %4, %6, %7 : vector<8x128xi1>, vector<8x128xf32>
    %c1_3 = arith.constant 1 : index
    %9 = memref.load %arg3[%c1_3] : memref<4xf32, #tpu.memory_space<smem>>
    %10 = vector.broadcast %9 : f32 to vector<8x128xf32>
    %11 = vector.broadcast %1 : f32 to vector<8x128xf32>
    %12 = arith.select %4, %10, %11 : vector<8x128xi1>, vector<8x128xf32>
    %c2_i32 = arith.constant 2 : i32
    %13 = vector.broadcast %c2_i32 : i32 to vector<8x128xi32>
    %14 = arith.cmpi eq, %2, %13 : vector<8x128xi32>
    %c2 = arith.constant 2 : index
    %15 = memref.load %arg2[%c2] : memref<4xf32, #tpu.memory_space<smem>>
    %16 = vector.broadcast %15 : f32 to vector<8x128xf32>
    %17 = arith.select %14, %16, %8 : vector<8x128xi1>, vector<8x128xf32>
    %c2_4 = arith.constant 2 : index
    %18 = memref.load %arg3[%c2_4] : memref<4xf32, #tpu.memory_space<smem>>
    %19 = vector.broadcast %18 : f32 to vector<8x128xf32>
    %20 = arith.select %14, %19, %12 : vector<8x128xi1>, vector<8x128xf32>
    %c3_i32 = arith.constant 3 : i32
    %21 = vector.broadcast %c3_i32 : i32 to vector<8x128xi32>
    %22 = arith.cmpi eq, %2, %21 : vector<8x128xi32>
    %c3 = arith.constant 3 : index
    %23 = memref.load %arg2[%c3] : memref<4xf32, #tpu.memory_space<smem>>
    %24 = vector.broadcast %23 : f32 to vector<8x128xf32>
    %25 = arith.select %22, %24, %17 : vector<8x128xi1>, vector<8x128xf32>
    %c3_5 = arith.constant 3 : index
    %26 = memref.load %arg3[%c3_5] : memref<4xf32, #tpu.memory_space<smem>>
    %27 = vector.broadcast %26 : f32 to vector<8x128xf32>
    %28 = arith.select %22, %27, %20 : vector<8x128xi1>, vector<8x128xf32>
    %c0_6 = arith.constant 0 : index
    %c0_7 = arith.constant 0 : index
    %29 = vector.load %arg5[%c0_6, %c0_7] : memref<8x128xf32, #tpu.memory_space<vmem>>, vector<8x128xf32>
    %c0_8 = arith.constant 0 : index
    %c0_9 = arith.constant 0 : index
    %30 = vector.load %arg6[%c0_8, %c0_9] : memref<8x128xf32, #tpu.memory_space<vmem>>, vector<8x128xf32>
    %31 = arith.mulf %29, %30 : vector<8x128xf32>
    %32 = arith.mulf %28, %31 : vector<8x128xf32>
    %33 = arith.addf %25, %32 : vector<8x128xf32>
    %c0_10 = arith.constant 0 : index
    %c0_11 = arith.constant 0 : index
    %34 = vector.load %arg7[%c0_10, %c0_11] : memref<8x128xf32, #tpu.memory_space<vmem>>, vector<8x128xf32>
    tpu.vector_store %arg7[%c0_10, %c0_11], %33 {strides = array<i32>} : memref<8x128xf32, #tpu.memory_space<vmem>>, vector<8x128xf32>,
    return
  }
  func.func @transform_0(%arg0: i32, %arg1: i32) -> i32 {
    %c0_i32 = arith.constant 0 : i32
    %c0_i32_0 = arith.constant 0 : i32
    return %c0_i32 : i32
  }
  func.func @transform_1(%arg0: i32, %arg1: i32) -> i32 {
    %c0_i32 = arith.constant 0 : i32
    %c0_i32_0 = arith.constant 0 : i32
    return %c0_i32 : i32
  }
  func.func @transform_2(%arg0: i32, %arg1: i32) -> (i32, i32) {
    %c0_i32 = arith.constant 0 : i32
    return %arg0, %arg1 : i32, i32
  }
  func.func @transform_3(%arg0: i32, %arg1: i32) -> (i32, i32) {
    %c0_i32 = arith.constant 0 : i32
    return %arg0, %arg1 : i32, i32
  }
  func.func @transform_4(%arg0: i32, %arg1: i32) -> (i32, i32) {
    %c0_i32 = arith.constant 0 : i32
    return %arg0, %arg1 : i32, i32
  }
  func.func @transform_5(%arg0: i32, %arg1: i32) -> (i32, i32) {
    %c0_i32 = arith.constant 0 : i32
    return %arg0, %arg1 : i32, i32
  }
}

</mosaic_0001>

<bundles_post_ra>
// kernel: tpu_custom_call.1
= control target key start
LH: loop header
LB: loop body
LE: loop exit
PB: predicated region body
PF: predicated region fallthrough
CT: control target
= control target key end

     0   :  { %10 = vsyncpa [#allocation5], 0  ;;  %s316_s0 = inlined_call_operand.hbm [shape: f32[4], index: 0, kind: input, shape index: {}]   ;;  %s317_s1 = inlined_call_operand.vmem [shape: f32[4], index: 1, kind: input, shape index: {}]   ;;  %s318_s2 = inlined_call_operand.hbm [shape: s32[8,128], index: 2, kind: input, shape index: {}]   ;;  %s319_s3 = inlined_call_operand.vmem [shape: f32[8,128], index: 3, kind: input, shape index: {}]   ;;  %s320_s4 = inlined_call_operand.hbm [shape: f32[8,128], index: 4, kind: input, shape index: {}]   ;;  %s321_s5 = inlined_call_operand.hbm [shape: f32[8,128], index: 5, kind: output, shape index: {}]  }
   0x1   :  { %11 = vsyncpa [#allocation6], 0 }
   0x2   :  { %12 = vsyncpa [#allocation3], 0 }
   0x3   :  { %13 = vsyncpa [#allocation10], 0 }
   0x4   :  { %14 = vsyncpa [#allocation4], 0  ;;  %s29_s20 = sshll.u32 %s317_s1, 4  ;;  %s129_s23 = scalar_lea.hbm %s316_s0, 16  ;;  %s30_s20 = int_to_ptr.vmem [resolvable:$true] %s29_s20 }
   0x5   :  { %p130_p0 = scmp.ne.s32.totalorder %s316_s0, %s129_s23  ;;  %p133_p1 = scmp.lt.u32.totalorder %s129_s23, %s316_s0 }
   0x7   :  { %p135_p2 = pnand %p133_p1, %p130_p0 }
   0x9   :  { %138 = shalt.err (!%p135_p2)
}
   0xa   :  { %s227_s28 = smov [#allocation2]   ;;  %s139_s1 = scalar_lea.vmem %s30_s20, 16 }
   0xb   :  { %22 = dma.hbm_to_smem %s316_s0, 16, %s227_s28, [#allocation5]  }
   0xc   :  { %p140_p3 = scmp.ne.s32.totalorder %s30_s20, %s139_s1  ;;  %p144_p4 = scmp.lt.s32.totalorder %s30_s20, %s30_s20 }
   0xd   :  { %p145_p5 = scmp.lt.s32.totalorder %s139_s1, %s139_s1 }
   0xf   :  { %p146_p6 = por %p145_p5, %p144_p4 }
  0x11   :  { %p147_p7 = pnand %p146_p6, %p140_p3 }
  0x13   :  { %150 = shalt.err (!%p147_p7)
}
  0x14   :  { %s228_s6 = smov [#allocation7]   ;;  %s229_s7 = smov [#allocation8]  }
  0x15   :  { %32 = dma.vmem_to_smem %s30_s20, 16, %s228_s6, [#allocation6]  }
  0x16   :  { %s39_s8 = sshll.u32 %s229_s7, 4  ;;  %s230_s9 = smov [#allocation9]   ;;  %s40_s8 = int_to_ptr.vmem [resolvable:$true] %s39_s8 }
  0x17   :  { %s51_s10 = sshll.u32 %s230_s9, 4  ;;  %s151_s0 = scalar_lea.hbm %s318_s2, 128  ;;  %s52_s10 = int_to_ptr.vmem [resolvable:$true] %s51_s10 }
  0x18   :  { %p152_p8 = scmp.ne.s32.totalorder %s318_s2, %s151_s0  ;;  %p155_p9 = scmp.lt.u32.totalorder %s151_s0, %s318_s2 }
  0x1a   :  { %p157_p10 = pnand %p155_p9, %p152_p8 }
  0x1c   :  { %160 = shalt.err (!%p157_p10)
}
  0x1d   :  { %s161_s17 = scalar_lea.vmem %s40_s8, 128  ;;  %p166_p12 = scmp.lt.s32.totalorder %s40_s8, %s40_s8 }
  0x1e   :  { %p162_p11 = scmp.ne.s32.totalorder %s40_s8, %s161_s17  ;;  %p167_p13 = scmp.lt.s32.totalorder %s161_s17, %s161_s17 }
  0x20   :  { %p168_p0 = por %p167_p13, %p166_p12 }
  0x22   :  { %p169_p1 = pnand %p168_p0, %p162_p11 }
  0x24   :  { %172 = shalt.err (!%p169_p1)
}
  0x25   :  { %42 = dma.hbm_to_vmem [thread:$0]  %s318_s2, 128, %s40_s8, [#allocation3]  }
  0x26   :  { %s173_s22 = scalar_lea.hbm %s320_s4, 128 }
  0x27   :  { %p174_p2 = scmp.ne.s32.totalorder %s320_s4, %s173_s22  ;;  %p177_p3 = scmp.lt.u32.totalorder %s173_s22, %s320_s4 }
  0x29   :  { %p179_p4 = pnand %p177_p3, %p174_p2 }
  0x2b   :  { %182 = shalt.err (!%p179_p4)
}
  0x2c   :  { %s183_s27 = scalar_lea.vmem %s52_s10, 128  ;;  %p188_p6 = scmp.lt.s32.totalorder %s52_s10, %s52_s10 }
  0x2d   :  { %p184_p5 = scmp.ne.s32.totalorder %s52_s10, %s183_s27  ;;  %p189_p7 = scmp.lt.s32.totalorder %s183_s27, %s183_s27 }
  0x2f   :  { %p190_p8 = por %p189_p7, %p188_p6 }
  0x31   :  { %p191_p9 = pnand %p190_p8, %p184_p5 }
  0x33   :  { %194 = shalt.err (!%p191_p9)
}
  0x34   :  { %54 = dma.hbm_to_vmem [thread:$0]  %s320_s4, 128, %s52_s10, [#allocation10]  }
  0x35   :  { %217 = dma.done.wait [#allocation5], 16  }
  0x36   :  { %218 = vsyncadd [#allocation5], 4294967280 }
  0x37   :  { %219 = dma.done.wait [#allocation6], 16  }
  0x38   :  { %220 = vsyncadd [#allocation6], 4294967280 }
  0x39   :  { %221 = dma.done.wait [#allocation3], 128  }
  0x3a   :  { %222 = vsyncadd [#allocation3], 4294967168 }
  0x3b   :  { %223 = dma.done.wait [#allocation10], 128  }
  0x3c   :  { %224 = vsyncadd [#allocation10], 4294967168 }
  0x3d   :  { %67 = sfence }
  0x3e   :  { %s68_s29 = sld [smem:[#allocation2]]  ;;  %s118_s1 = sld [smem:[#allocation2 + $0x1]]  ;;  %v70_v0 = vld [vmem:[#allocation8] sm:$0xff]  ;;  %v94_v1 = vld [vmem:[%s319_s3] sm:$0xff]  ;;  %v95_v2 = vld [vmem:[#allocation9] sm:$0xff] }
  0x3f   :  { %s69_s30 = sld [smem:[#allocation7]]  ;;  %s119_s6 = sld [smem:[#allocation7 + $0x1]]  ;;  %vm71_vm0 = vcmp.eq.s32.totalorder %v70_v0, 1  ;;  %vm80_vm1 = vcmp.eq.s32.totalorder %v70_v0, 2  ;;  %vm87_vm2 = vcmp.eq.s32.totalorder %v70_v0, 3  ;;  %v96_v7 = vmul.f32 %v95_v2, %v94_v1 }
  0x40   :  { %s120_s7 = sld [smem:[#allocation2 + $0x2]]  ;;  %s122_s9 = sld [smem:[#allocation2 + $0x3]] }
  0x41   :  { %s121_s8 = sld [smem:[#allocation7 + $0x2]]  ;;  %s123_s11 = sld [smem:[#allocation7 + $0x3]] }
  0x42   :  { %s231_s3 = smov [#allocation11]  }
  0x43   :  { %s106_s10 = sshll.u32 %s231_s3, 4  ;;  %s107_s10 = int_to_ptr.vmem [resolvable:$true] %s106_s10 }
  0x44   :  { %v74_v3 = vstv %s68_s29  ;;  %v73_v5 = vstv %s118_s1  ;;  %s195_s0 = scalar_lea.vmem %s107_s10, 128  ;;  %p200_p11 = scmp.lt.s32.totalorder %s107_s10, %s107_s10 }
  0x45   :  { %v78_v4 = vstv %s69_s30  ;;  %v77_v6 = vstv %s119_s6  ;;  %v75_v8 = vsel %vm71_vm0, %v73_v5, %v74_v3  ;;  %p196_p10 = scmp.ne.s32.totalorder %s107_s10, %s195_s0  ;;  %p201_p12 = scmp.lt.s32.totalorder %s195_s0, %s195_s0 }
  0x46   :  { %v79_v9 = vsel %vm71_vm0, %v77_v6, %v78_v4  ;;  %v82_v10 = vstv %s120_s7  ;;  %v89_v14 = vstv %s122_s9 }
  0x47   :  { %v85_v11 = vstv %s121_s8  ;;  %v83_v12 = vsel %vm80_vm1, %v82_v10, %v75_v8  ;;  %v92_v15 = vstv %s123_s11  ;;  %p202_p13 = por %p201_p12, %p200_p11 }
  0x48   :  { %v86_v13 = vsel %vm80_vm1, %v85_v11, %v79_v9  ;;  %v90_v16 = vsel %vm87_vm2, %v89_v14, %v83_v12 }
  0x49   :  { %v93_v17 = vsel %vm87_vm2, %v92_v15, %v86_v13  ;;  %p203_p0 = pnand %p202_p13, %p196_p10 }
  0x4a   :  { %v97_v18 = vmul.f32 %v96_v7, %v93_v17 }
  0x4c   :  { %v98_v19 = vadd.f32 %v97_v18, %v90_v16 }
  0x4e   :  { %99 = vst [vmem:[#allocation11] sm:$0xff] %v98_v19 }
  0x4f   :  { %206 = shalt.err (!%p203_p0)
}
  0x50   :  { %s207_s15 = scalar_lea.hbm %s321_s5, 128 }
  0x51   :  { %p208_p1 = scmp.ne.s32.totalorder %s321_s5, %s207_s15  ;;  %p211_p2 = scmp.lt.u32.totalorder %s207_s15, %s321_s5 }
  0x53   :  { %p213_p3 = pnand %p211_p2, %p208_p1 }
  0x55   :  { %216 = shalt.err (!%p213_p3)
}
  0x56   :  { %109 = dma.vmem_to_hbm [thread:$0]  %s107_s10, 128, %s321_s5, [#allocation4]  }
  0x57   :  { %225 = dma.done.wait [#allocation4], 128  }
  0x58   :  { %226 = vsyncadd [#allocation4], 4294967168 }
  0x59   :  { %113 = vsyncpa [#allocation3], 1 }
  0x5a   :  { %114 = vsyncpa [#allocation10], 1 }
  0x5b   :  { %115 = vsyncpa [#allocation4], 1 }
  0x5c   :  { %116 = vsyncpa [#allocation5], 1 }
  0x5d   :  { %117 = vsyncpa [#allocation6], 1 }

</bundles_post_ra>
